<compile_context>
chip_gen: v7x
topology: tpu7x:2x2x1
jax: 0.10.0
libtpu: 0.0.40
codegen_flags: <defaults>
</compile_context>

<pallas_src>
import functools

import jax
import jax.numpy as jnp
from jax.experimental import pallas as pl
from jax.experimental.pallas import tpu as pltpu


def _round_up(x, m):
    return ((x + m - 1) // m) * m


def _tile_terms(at_target, n_true, l_true,
                logits_ref, labels_ref, biases_ref, lambdas_ref):
    """Masked per-tile weighted cross-entropy terms -> (valid, labels, wce)."""
    j = pl.program_id(0)                       # label block (parallel)
    i = pl.program_id(1)                       # batch block (arbitrary, inner)
    tb, tl = logits_ref.shape

    # Ragged-edge masks: the (N, L) streams are NOT padded in HBM, so OOB lanes
    # of boundary blocks hold garbage.  Mask with jnp.where BEFORE arithmetic.
    row_ok = (i * tb + jax.lax.broadcasted_iota(jnp.int32, (tb, 1), 0)) < n_true
    col_ok = (j * tl + jax.lax.broadcasted_iota(jnp.int32, (1, tl), 1)) < l_true
    valid = jnp.logical_and(row_ok, col_ok)                     # (tb, tl)

    logits = jnp.where(valid, logits_ref[...].astype(jnp.float32), 0.0)
    labels = jnp.where(valid, labels_ref[...].astype(jnp.float32), 0.0)

    lam = jnp.abs(lambdas_ref[...])                              # (1, tl), pads 0
    pos_w = 1.0 + lam * (1.0 - at_target)                        # P@R hooks
    neg_w = lam * at_target

    x = logits - biases_ref[...]
    softplus = jnp.maximum(-x, 0.0) + jnp.log1p(jnp.exp(-jnp.abs(x)))
    wdf = neg_w + (pos_w - neg_w) * labels
    wce = neg_w * (x - labels * x) + wdf * softplus
    return valid, labels, wce


def _accumulate(i, w, labels, wce, loss_ref, w_ref, wy_ref):
    @pl.when(i == 0)
    def _():
        loss_ref[...] = jnp.zeros_like(loss_ref)
        w_ref[...] = jnp.zeros_like(w_ref)
        wy_ref[...] = jnp.zeros_like(wy_ref)

    loss_ref[...] += jnp.sum(w * wce, axis=0, keepdims=True)
    w_ref[...] += jnp.sum(w, axis=0, keepdims=True)
    wy_ref[...] += jnp.sum(w * labels, axis=0, keepdims=True)


def _kernel_unweighted(at_target, n_true, l_true,
                       logits_ref, labels_ref, biases_ref, lambdas_ref,
                       loss_ref, w_ref, wy_ref):
    valid, labels, wce = _tile_terms(at_target, n_true, l_true,
                                     logits_ref, labels_ref,
                                     biases_ref, lambdas_ref)
    w = valid.astype(jnp.float32)              # implicit all-ones weights
    _accumulate(pl.program_id(1), w, labels, wce, loss_ref, w_ref, wy_ref)


def _kernel_weighted(at_target, n_true, l_true,
                     logits_ref, labels_ref, weights_ref, biases_ref,
                     lambdas_ref, loss_ref, w_ref, wy_ref):
    valid, labels, wce = _tile_terms(at_target, n_true, l_true,
                                     logits_ref, labels_ref,
                                     biases_ref, lambdas_ref)
    # weights_ref block may be (tb, tl), (tb, 1) or (1, tl); broadcast in VMEM.
    w = jnp.where(valid, weights_ref[...].astype(jnp.float32), 0.0)
    _accumulate(pl.program_id(1), w, labels, wce, loss_ref, w_ref, wy_ref)


@functools.partial(
    jax.jit,
    static_argnames=("at_target", "dual_factor", "size_average",
                     "block_batch", "block_labels"))
def base_loss_forward(logits, labels, weights=None, label_priors=None, *,
                      at_target=0.7, dual_factor=0.1,
                      biases=None, lambdas=None,
                      size_average=True, block_batch=None, block_labels=None):
    """Forward of BaseLoss (non-AUC, cross-entropy, reduce=True)."""
    del dual_factor  # only scales the custom backward of lagrange_multiplier
    n, num_labels = logits.shape

    if biases is None:
        biases = jnp.zeros((num_labels,), jnp.float32)
    if lambdas is None:
        lambdas = jnp.ones((num_labels,), jnp.float32)

    # ---- tile selection: lane-dense, ~2 MiB f32 per stream per grid step ----
    tl = int(block_labels) if block_labels is not None else min(
        512, _round_up(num_labels, 128))
    if block_batch is not None:
        tb = int(block_batch)
    else:
        tb = max(256, (2 * 1024 * 1024) // (tl * 4))
        tb = min(_round_up(tb, 32), 2048)
        tb = min(tb, _round_up(n, 32))
    tb = max(tb, 8)

    nlb = pl.cdiv(num_labels, tl)
    nb = pl.cdiv(n, tb)
    l_pad = nlb * tl

    # Only the tiny per-label parameter rows get padded (zero pads are inert);
    # the big (N, L) streams are passed unpadded and unbroadcast.
    def pad_param(p):
        p = p.astype(jnp.float32).reshape(1, num_labels)
        return jnp.pad(p, ((0, 0), (0, l_pad - num_labels)))

    biases_p = pad_param(biases)
    lambdas_p = pad_param(lambdas)

    data_spec = pl.BlockSpec((tb, tl), lambda j, i: (i, j))
    param_spec = pl.BlockSpec((1, tl), lambda j, i: (0, j))
    out_spec = pl.BlockSpec((1, tl), lambda j, i: (0, j))   # resident over batch

    stream_block_bytes = tb * tl * (logits.dtype.itemsize + labels.dtype.itemsize)

    if weights is None:
        kernel = functools.partial(_kernel_unweighted, float(at_target), n,
                                   num_labels)
        in_specs = [data_spec, data_spec, param_spec, param_spec]
        args = (logits, labels, biases_p, lambdas_p)
        bytes_in = (logits.size * logits.dtype.itemsize
                    + labels.size * labels.dtype.itemsize)
    else:
        w = weights
        if w.ndim == 0:
            w = jnp.broadcast_to(w.reshape(1, 1), (1, num_labels))
        elif w.ndim == 1:
            w = w.reshape(n, 1) if w.shape[0] == n else w.reshape(1, -1)
        if w.shape == (n, 1):                                  # per-example
            w_spec = pl.BlockSpec((tb, 1), lambda j, i: (i, 0))
            stream_block_bytes += tb * w.dtype.itemsize
        elif w.shape == (1, num_labels):                       # per-label
            w = jnp.pad(w.astype(jnp.float32), ((0, 0), (0, l_pad - num_labels)))
            w_spec = param_spec
            stream_block_bytes += tl * 4
        else:                                                  # dense (N, L)
            if w.shape != (n, num_labels):
                # TODO(synk): uncommon weight shapes fall back to dense broadcast.
                w = jnp.broadcast_to(w, (n, num_labels))
            w_spec = data_spec
            stream_block_bytes += tb * tl * w.dtype.itemsize
        kernel = functools.partial(_kernel_weighted, float(at_target), n,
                                   num_labels)
        in_specs = [data_spec, data_spec, w_spec, param_spec, param_spec]
        args = (logits, labels, w, biases_p, lambdas_p)
        bytes_in = (logits.size * logits.dtype.itemsize
                    + labels.size * labels.dtype.itemsize
                    + w.size * w.dtype.itemsize)

    # Explicit VMEM budget: double-buffered streams/params + 3 output rows.
    vmem_need = 2 * (stream_block_bytes + 2 * tl * 4) + 2 * 3 * tl * 4
    vmem_limit = int(min(48 * 2 ** 20, max(4 * 2 ** 20, 2 * vmem_need)))

    out_sds = jax.ShapeDtypeStruct((1, l_pad), jnp.float32)
    loss_sums, w_sums, wy_sums = pl.pallas_call(
        kernel,
        out_shape=(out_sds, out_sds, out_sds),
        grid=(nlb, nb),
        in_specs=in_specs,
        out_specs=(out_spec, out_spec, out_spec),
        compiler_params=pltpu.CompilerParams(
            dimension_semantics=("parallel", "arbitrary"),
            vmem_limit_bytes=vmem_limit),
        cost_estimate=pl.CostEstimate(
            flops=15 * n * num_labels,
            transcendentals=2 * n * num_labels,
            bytes_accessed=int(bytes_in) + 2 * 4 * l_pad + 3 * 4 * l_pad),
    )(*args)

    # Finalize (tiny, fused under jit): label priors, lambda_term, reduction.
    lam = jnp.abs(lambdas_p)[0]                                  # (l_pad,)
    if label_priors is not None:
        priors = jnp.pad(label_priors.astype(jnp.float32).reshape(-1),
                         (0, l_pad - num_labels))
    else:
        priors = (wy_sums[0] + 1.0) / (w_sums[0] + 2.0)          # +1/+2 pseudocounts
    lambda_term = lam * (1.0 - at_target) * priors               # 0 on pad columns
    total = jnp.sum(loss_sums) - n * jnp.sum(lambda_term)
    if size_average:
        total = total / (n * num_labels)
    return total
    # TODO(synk): reduce=False (per-element loss), the is_auc anchor path and
    # the hinge loss variant are not implemented in this kernel.


def _reference_forward(logits, labels, weights, at_target, biases, lambdas):
    """Pure-JAX reference for a sanity check."""
    logits = logits.astype(jnp.float32)
    labels = labels.astype(jnp.float32)
    weights = jnp.broadcast_to(weights.astype(jnp.float32), logits.shape)
    lam = jnp.abs(lambdas)[None, :]
    b = biases[None, :]
    w_sum = jnp.sum(weights, axis=0)
    wy_sum = jnp.sum(weights * labels, axis=0)
    priors = (wy_sum + 1.0) / (w_sum + 2.0)
    lambda_term = lam * (1.0 - at_target) * priors[None, :]
    pos_w = 1.0 + lam * (1.0 - at_target)
    neg_w = lam * at_target
    x = logits - b
    sp = jnp.maximum(-x, 0.0) + jnp.log1p(jnp.exp(-jnp.abs(x)))
    wdf = neg_w + (pos_w - neg_w) * labels
    wce = neg_w * (x - labels * x) + wdf * sp
    loss = weights * wce - lambda_term
    return jnp.mean(loss)


if __name__ == "__main__":
    key = jax.random.PRNGKey(0)

    # Case 1: module-sized small shapes, dense (N, L) weights.
    k1, k2, k3 = jax.random.split(key, 3)
    batch, num_labels = 8, 16
    logits = jax.random.normal(k1, (batch, num_labels), jnp.float32)
    labels = (jax.random.uniform(k2, (batch, num_labels)) > 0.5).astype(jnp.float32)
    weights = jax.random.uniform(k3, (batch, num_labels), jnp.float32) + 0.5
    biases = jnp.zeros((num_labels,), jnp.float32)
    lambdas = jnp.ones((num_labels,), jnp.float32)

    loss_w = base_loss_forward(logits, labels, weights, at_target=0.7,
                               biases=biases, lambdas=lambdas)
    loss_w = jax.block_until_ready(loss_w)
    ref_w = _reference_forward(logits, labels, weights, 0.7, biases, lambdas)
    assert jnp.allclose(loss_w, ref_w, atol=1e-5, rtol=1e-5), (loss_w, ref_w)

    # Case 2: weights=None path, ragged label dimension (L=300 inside tl=384).
    k4, k5 = jax.random.split(k3)
    b2, l2 = 24, 300
    logits2 = jax.random.normal(k4, (b2, l2), jnp.float32)
    labels2 = (jax.random.uniform(k5, (b2, l2)) > 0.5).astype(jnp.float32)
    biases2 = 0.1 * jnp.arange(l2, dtype=jnp.float32) / l2
    lambdas2 = jnp.ones((l2,), jnp.float32) * 1.3

    loss_u = base_loss_forward(logits2, labels2, None, at_target=0.7,
                               biases=biases2, lambdas=lambdas2)
    loss_u = jax.block_until_ready(loss_u)
    ref_u = _reference_forward(logits2, labels2, jnp.ones_like(logits2), 0.7,
                               biases2, lambdas2)
    assert jnp.allclose(loss_u, ref_u, atol=1e-5, rtol=1e-5), (loss_u, ref_u)

    # Case 3: bf16 streams, per-example (N,) weights, multi-block ragged grid.
    k6, k7, k8 = jax.random.split(k5, 3)
    b3, l3 = 50, 150
    logits3 = jax.random.normal(k6, (b3, l3), jnp.float32).astype(jnp.bfloat16)
    labels3 = (jax.random.uniform(k7, (b3, l3)) > 0.5).astype(jnp.bfloat16)
    weights3 = jax.random.uniform(k8, (b3,), jnp.float32) + 0.5
    biases3 = jnp.zeros((l3,), jnp.float32)
    lambdas3 = jnp.full((l3,), 0.8, jnp.float32)

    loss_r = base_loss_forward(logits3, labels3, weights3, at_target=0.4,
                               biases=biases3, lambdas=lambdas3,
                               block_batch=16, block_labels=128)
    loss_r = jax.block_until_ready(loss_r)
    ref_r = _reference_forward(logits3, labels3, weights3.reshape(-1, 1), 0.4,
                               biases3, lambdas3)
    assert jnp.allclose(loss_r, ref_r, atol=1e-4, rtol=1e-4), (loss_r, ref_r)

    print("KERNEL_OK")
</pallas_src>

<mosaic_0001>
module attributes {stable_mosaic.version = 11 : i64} {
  func.func @_kernel_weighted(%arg0: i32, %arg1: i32, %arg2: memref<32x128xf32, #tpu.memory_space<vmem>>, %arg3: memref<32x128xf32, #tpu.memory_space<vmem>>, %arg4: memref<32x128xf32, #tpu.memory_space<vmem>>, %arg5: memref<1x128xf32, #tpu.memory_space<vmem>>, %arg6: memref<1x128xf32, #tpu.memory_space<vmem>>, %arg7: memref<1x128xf32, #tpu.memory_space<vmem>>, %arg8: memref<1x128xf32, #tpu.memory_space<vmem>>, %arg9: memref<1x128xf32, #tpu.memory_space<vmem>>) attributes {dimension_semantics = [#tpu.dimension_semantics<parallel>, #tpu.dimension_semantics<arbitrary>], iteration_bounds = array<i64: 1, 1>, scalar_prefetch = 0 : i64, scratch_operands = 0 : i64, tpu.core_type = #tpu.core_type<tc>, window_params = [{transform_indices = @transform_0, window_bounds = array<i64: 32, 128>}, {transform_indices = @transform_1, window_bounds = array<i64: 32, 128>}, {transform_indices = @transform_2, window_bounds = array<i64: 32, 128>}, {transform_indices = @transform_3, window_bounds = array<i64: 1, 128>}, {transform_indices = @transform_4, window_bounds = array<i64: 1, 128>}, {transform_indices = @transform_5, window_bounds = array<i64: 1, 128>}, {transform_indices = @transform_6, window_bounds = array<i64: 1, 128>}, {transform_indices = @transform_7, window_bounds = array<i64: 1, 128>}]} {
    %c32_i32 = arith.constant 32 : i32
    %0 = arith.muli %arg1, %c32_i32 : i32
    %1 = tpu.iota {dimensions = array<i32: 0>} : vector<32x1xi32>
    %2 = vector.broadcast %0 : i32 to vector<32x1xi32>
    %3 = arith.addi %2, %1 : vector<32x1xi32>
    %c8_i32 = arith.constant 8 : i32
    %4 = vector.broadcast %c8_i32 : i32 to vector<32x1xi32>
    %5 = arith.cmpi slt, %3, %4 : vector<32x1xi32>
    %c128_i32 = arith.constant 128 : i32
    %6 = arith.muli %arg0, %c128_i32 : i32
    %7 = tpu.iota {dimensions = array<i32: 1>} : vector<1x128xi32>
    %8 = vector.broadcast %6 : i32 to vector<1x128xi32>
    %9 = arith.addi %8, %7 : vector<1x128xi32>
    %c16_i32 = arith.constant 16 : i32
    %10 = vector.broadcast %c16_i32 : i32 to vector<1x128xi32>
    %11 = arith.cmpi slt, %9, %10 : vector<1x128xi32>
    %12 = vector.broadcast %5 : vector<32x1xi1> to vector<32x128xi1>
    %13 = vector.broadcast %11 : vector<1x128xi1> to vector<32x128xi1>
    %14 = arith.andi %12, %13 : vector<32x128xi1>
    %c0 = arith.constant 0 : index
    %c0_0 = arith.constant 0 : index
    %15 = vector.load %arg2[%c0, %c0_0] : memref<32x128xf32, #tpu.memory_space<vmem>>, vector<32x128xf32>
    %cst = arith.constant 0.000000e+00 : f32
    %16 = vector.broadcast %cst : f32 to vector<32x128xf32>
    %17 = arith.select %14, %15, %16 : vector<32x128xi1>, vector<32x128xf32>
    %c0_1 = arith.constant 0 : index
    %c0_2 = arith.constant 0 : index
    %18 = vector.load %arg3[%c0_1, %c0_2] : memref<32x128xf32, #tpu.memory_space<vmem>>, vector<32x128xf32>
    %cst_3 = arith.constant 0.000000e+00 : f32
    %19 = vector.broadcast %cst_3 : f32 to vector<32x128xf32>
    %20 = arith.select %14, %18, %19 : vector<32x128xi1>, vector<32x128xf32>
    %c0_4 = arith.constant 0 : index
    %c0_5 = arith.constant 0 : index
    %21 = vector.load %arg6[%c0_4, %c0_5] : memref<1x128xf32, #tpu.memory_space<vmem>>, vector<1x128xf32>
    %22 = math.absf %21 : vector<1x128xf32>
    %cst_6 = arith.constant 3.000000e-01 : f32
    %23 = vector.broadcast %cst_6 : f32 to vector<1x128xf32>
    %24 = arith.mulf %22, %23 : vector<1x128xf32>
    %cst_7 = arith.constant 1.000000e+00 : f32
    %25 = vector.broadcast %cst_7 : f32 to vector<1x128xf32>
    %26 = arith.addf %25, %24 : vector<1x128xf32>
    %cst_8 = arith.constant 0.699999988 : f32
    %27 = vector.broadcast %cst_8 : f32 to vector<1x128xf32>
    %28 = arith.mulf %22, %27 : vector<1x128xf32>
    %c0_9 = arith.constant 0 : index
    %c0_10 = arith.constant 0 : index
    %29 = vector.load %arg5[%c0_9, %c0_10] : memref<1x128xf32, #tpu.memory_space<vmem>>, vector<1x128xf32>
    %30 = vector.broadcast %29 : vector<1x128xf32> to vector<32x128xf32>
    %31 = arith.subf %17, %30 : vector<32x128xf32>
    %cst_11 = arith.constant 0.000000e+00 : f32
    %32 = vector.broadcast %cst_11 : f32 to vector<32x128xf32>
    %33 = arith.subf %32, %31 : vector<32x128xf32>
    %cst_12 = arith.constant 0.000000e+00 : f32
    %34 = vector.broadcast %cst_12 : f32 to vector<32x128xf32>
    %35 = arith.maximumf %33, %34 : vector<32x128xf32>
    %36 = math.absf %31 : vector<32x128xf32>
    %cst_13 = arith.constant 0.000000e+00 : f32
    %37 = vector.broadcast %cst_13 : f32 to vector<32x128xf32>
    %38 = arith.subf %37, %36 : vector<32x128xf32>
    %39 = math.exp %38 : vector<32x128xf32>
    %40 = math.log1p %39 : vector<32x128xf32>
    %41 = arith.addf %35, %40 : vector<32x128xf32>
    %42 = arith.subf %26, %28 : vector<1x128xf32>
    %43 = vector.broadcast %42 : vector<1x128xf32> to vector<32x128xf32>
    %44 = arith.mulf %43, %20 : vector<32x128xf32>
    %45 = vector.broadcast %28 : vector<1x128xf32> to vector<32x128xf32>
    %46 = arith.addf %45, %44 : vector<32x128xf32>
    %47 = arith.mulf %20, %31 : vector<32x128xf32>
    %48 = arith.subf %31, %47 : vector<32x128xf32>
    %49 = vector.broadcast %28 : vector<1x128xf32> to vector<32x128xf32>
    %50 = arith.mulf %49, %48 : vector<32x128xf32>
    %51 = arith.mulf %46, %41 : vector<32x128xf32>
    %52 = arith.addf %50, %51 : vector<32x128xf32>
    %c0_14 = arith.constant 0 : index
    %c0_15 = arith.constant 0 : index
    %53 = vector.load %arg4[%c0_14, %c0_15] : memref<32x128xf32, #tpu.memory_space<vmem>>, vector<32x128xf32>
    %cst_16 = arith.constant 0.000000e+00 : f32
    %54 = vector.broadcast %cst_16 : f32 to vector<32x128xf32>
    %55 = arith.select %14, %53, %54 : vector<32x128xi1>, vector<32x128xf32>
    %c0_i32 = arith.constant 0 : i32
    %56 = arith.cmpi eq, %arg1, %c0_i32 : i32
    %57 = arith.extui %56 : i1 to i32
    %c0_i32_17 = arith.constant 0 : i32
    %58 = arith.cmpi ne, %57, %c0_i32_17 : i32
    scf.if %58 {
      %cst_33 = arith.constant 0.000000e+00 : f32
      %76 = vector.broadcast %cst_33 : f32 to vector<1x128xf32>
      %c0_34 = arith.constant 0 : index
      %c0_35 = arith.constant 0 : index
      %77 = vector.load %arg7[%c0_34, %c0_35] : memref<1x128xf32, #tpu.memory_space<vmem>>, vector<1x128xf32>
      tpu.vector_store %arg7[%c0_34, %c0_35], %76 {strides = array<i32>} : memref<1x128xf32, #tpu.memory_space<vmem>>, vector<1x128xf32>,
      %cst_36 = arith.constant 0.000000e+00 : f32
      %78 = vector.broadcast %cst_36 : f32 to vector<1x128xf32>
      %c0_37 = arith.constant 0 : index
      %c0_38 = arith.constant 0 : index
      %79 = vector.load %arg8[%c0_37, %c0_38] : memref<1x128xf32, #tpu.memory_space<vmem>>, vector<1x128xf32>
      tpu.vector_store %arg8[%c0_37, %c0_38], %78 {strides = array<i32>} : memref<1x128xf32, #tpu.memory_space<vmem>>, vector<1x128xf32>,
      %cst_39 = arith.constant 0.000000e+00 : f32
      %80 = vector.broadcast %cst_39 : f32 to vector<1x128xf32>
      %c0_40 = arith.constant 0 : index
      %c0_41 = arith.constant 0 : index
      %81 = vector.load %arg9[%c0_40, %c0_41] : memref<1x128xf32, #tpu.memory_space<vmem>>, vector<1x128xf32>
      tpu.vector_store %arg9[%c0_40, %c0_41], %80 {strides = array<i32>} : memref<1x128xf32, #tpu.memory_space<vmem>>, vector<1x128xf32>,
    } else {
    }
    %c0_18 = arith.constant 0 : index
    %c0_19 = arith.constant 0 : index
    %59 = vector.load %arg7[%c0_18, %c0_19] : memref<1x128xf32, #tpu.memory_space<vmem>>, vector<1x128xf32>
    %60 = arith.mulf %55, %52 : vector<32x128xf32>
    %cst_20 = arith.constant dense<0.000000e+00> : vector<128xf32>
    %61 = vector.multi_reduction <add>, %60, %cst_20 [0] : vector<32x128xf32> to vector<128xf32>
    %62 = vector.shape_cast %61 : vector<128xf32> to vector<1x128xf32>
    %63 = arith.addf %59, %62 : vector<1x128xf32>
    %c0_21 = arith.constant 0 : index
    %c0_22 = arith.constant 0 : index
    %64 = vector.load %arg7[%c0_21, %c0_22] : memref<1x128xf32, #tpu.memory_space<vmem>>, vector<1x128xf32>
    tpu.vector_store %arg7[%c0_21, %c0_22], %63 {strides = array<i32>} : memref<1x128xf32, #tpu.memory_space<vmem>>, vector<1x128xf32>,
    %c0_23 = arith.constant 0 : index
    %c0_24 = arith.constant 0 : index
    %65 = vector.load %arg8[%c0_23, %c0_24] : memref<1x128xf32, #tpu.memory_space<vmem>>, vector<1x128xf32>
    %cst_25 = arith.constant dense<0.000000e+00> : vector<128xf32>
    %66 = vector.multi_reduction <add>, %55, %cst_25 [0] : vector<32x128xf32> to vector<128xf32>
    %67 = vector.shape_cast %66 : vector<128xf32> to vector<1x128xf32>
    %68 = arith.addf %65, %67 : vector<1x128xf32>
    %c0_26 = arith.constant 0 : index
    %c0_27 = arith.constant 0 : index
    %69 = vector.load %arg8[%c0_26, %c0_27] : memref<1x128xf32, #tpu.memory_space<vmem>>, vector<1x128xf32>
    tpu.vector_store %arg8[%c0_26, %c0_27], %68 {strides = array<i32>} : memref<1x128xf32, #tpu.memory_space<vmem>>, vector<1x128xf32>,
    %c0_28 = arith.constant 0 : index
    %c0_29 = arith.constant 0 : index
    %70 = vector.load %arg9[%c0_28, %c0_29] : memref<1x128xf32, #tpu.memory_space<vmem>>, vector<1x128xf32>
    %71 = arith.mulf %55, %20 : vector<32x128xf32>
    %cst_30 = arith.constant dense<0.000000e+00> : vector<128xf32>
    %72 = vector.multi_reduction <add>, %71, %cst_30 [0] : vector<32x128xf32> to vector<128xf32>
    %73 = vector.shape_cast %72 : vector<128xf32> to vector<1x128xf32>
    %74 = arith.addf %70, %73 : vector<1x128xf32>
    %c0_31 = arith.constant 0 : index
    %c0_32 = arith.constant 0 : index
    %75 = vector.load %arg9[%c0_31, %c0_32] : memref<1x128xf32, #tpu.memory_space<vmem>>, vector<1x128xf32>
    tpu.vector_store %arg9[%c0_31, %c0_32], %74 {strides = array<i32>} : memref<1x128xf32, #tpu.memory_space<vmem>>, vector<1x128xf32>,
    return
  }
  func.func @transform_0(%arg0: i32, %arg1: i32) -> (i32, i32) {
    %c0_i32 = arith.constant 0 : i32
    return %arg1, %arg0 : i32, i32
  }
  func.func @transform_1(%arg0: i32, %arg1: i32) -> (i32, i32) {
    %c0_i32 = arith.constant 0 : i32
    return %arg1, %arg0 : i32, i32
  }
  func.func @transform_2(%arg0: i32, %arg1: i32) -> (i32, i32) {
    %c0_i32 = arith.constant 0 : i32
    return %arg1, %arg0 : i32, i32
  }
  func.func @transform_3(%arg0: i32, %arg1: i32) -> (i32, i32) {
    %c0_i32 = arith.constant 0 : i32
    %c0_i32_0 = arith.constant 0 : i32
    return %c0_i32, %arg0 : i32, i32
  }
  func.func @transform_4(%arg0: i32, %arg1: i32) -> (i32, i32) {
    %c0_i32 = arith.constant 0 : i32
    %c0_i32_0 = arith.constant 0 : i32
    return %c0_i32, %arg0 : i32, i32
  }
  func.func @transform_5(%arg0: i32, %arg1: i32) -> (i32, i32) {
    %c0_i32 = arith.constant 0 : i32
    %c0_i32_0 = arith.constant 0 : i32
    return %c0_i32, %arg0 : i32, i32
  }
  func.func @transform_6(%arg0: i32, %arg1: i32) -> (i32, i32) {
    %c0_i32 = arith.constant 0 : i32
    %c0_i32_0 = arith.constant 0 : i32
    return %c0_i32, %arg0 : i32, i32
  }
  func.func @transform_7(%arg0: i32, %arg1: i32) -> (i32, i32) {
    %c0_i32 = arith.constant 0 : i32
    %c0_i32_0 = arith.constant 0 : i32
    return %c0_i32, %arg0 : i32, i32
  }
}

</mosaic_0001>

<bundles_post_ra>
// kernel: base_loss_forward.1
= control target key start
LH: loop header
LB: loop body
LE: loop exit
PB: predicated region body
PF: predicated region fallthrough
CT: control target
= control target key end

     0   :  { %13 = vsyncpa [#allocation3], 0  ;;  %s431_s0 = inlined_call_operand.vmem [shape: f32[8,16], index: 0, kind: input, shape index: {}]   ;;  %s432_s1 = inlined_call_operand.vmem [shape: f32[8,16], index: 1, kind: input, shape index: {}]   ;;  %s433_s2 = inlined_call_operand.hbm [shape: f32[8,16], index: 2, kind: input, shape index: {}]   ;;  %s434_s3 = inlined_call_operand.vmem [shape: f32[1,128], index: 3, kind: input, shape index: {}]   ;;  %s435_s4 = inlined_call_operand.vmem [shape: f32[1,128], index: 4, kind: input, shape index: {}]   ;;  %s436_s5 = inlined_call_operand.vmem [shape: f32[1,128], index: 5, kind: output, shape index: {0}]   ;;  %s437_s6 = inlined_call_operand.vmem [shape: f32[1,128], index: 6, kind: output, shape index: {1}]   ;;  %s438_s7 = inlined_call_operand.vmem [shape: f32[1,128], index: 7, kind: output, shape index: {2}]  }
   0x1   :  { %22 = vsyncadd [#allocation3], 384  ;;  %s318_s24 = smov [#allocation2]   ;;  %s294_s28 = scalar_lea.hbm %s433_s2, 128 }
   0x2   :  { %s23_s25 = sshll.u32 %s318_s24, 4  ;;  %p295_p0 = scmp.ne.s32.totalorder %s433_s2, %s294_s28  ;;  %s24_s25 = int_to_ptr.vmem [resolvable:$true] %s23_s25 }
   0x3   :  { %p298_p1 = scmp.lt.u32.totalorder %s294_s28, %s433_s2 }
   0x5   :  { %p300_p2 = pnand %p298_p1, %p295_p0 }
   0x7   :  { %303 = shalt.err (!%p300_p2)
}
   0x8   :  { %s304_s10 = scalar_lea.vmem %s24_s25, 128  ;;  %s308_s11 = scalar_lea.vmem %s24_s25, 512 }
   0x9   :  { %p305_p3 = scmp.ne.s32.totalorder %s24_s25, %s304_s10  ;;  %p309_p4 = scmp.lt.s32.totalorder %s24_s25, %s24_s25 }
   0xa   :  { %p310_p5 = scmp.lt.s32.totalorder %s308_s11, %s304_s10 }
   0xc   :  { %p311_p6 = por %p310_p5, %p309_p4 }
   0xe   :  { %p312_p7 = pnand %p311_p6, %p305_p3 }
  0x10   :  { %315 = shalt.err (!%p312_p7)
}
  0x11   :  { %s319_s12 = smov 128   ;;  %s320_s13 = smov 8  }
  0x12   :  { %29 = dma.hbm_to_vmem [thread:$0]  %s433_s2, 128, %s24_s25, [#allocation3], %s319_s12, %s319_s12, %s320_s13  }
  0x13   :  { %316 = dma.done.wait [#allocation3], 512  }
  0x14   :  { %317 = vsyncadd [#allocation3], 4294966784  ;;  %v53_v0 = vlaneseq  ;;  %v321_v1 = vmov 0.0   ;;  %v72_v3 = vld [vmem:[%s431_s0] sm:$0xff] }
  0x15   :  { %221 = vst [vmem:[%s436_s5] sm:$0x1] %v321_v1  ;;  %222 = vst [vmem:[%s437_s6] sm:$0x1] %v321_v1  ;;  %v281_v5 = vld [vmem:[%s434_s3] ss:$0 sm:$0xff] }
  0x16   :  { %223 = vst [vmem:[%s438_s7] sm:$0x1] %v321_v1  ;;  %v54_v2 = vand.u32 127, %v53_v0  ;;  %v391_v7 = vsub.f32 0.0, %v281_v5  ;;  %v209_v8 = vld [vmem:[#allocation2] sm:$0xff]  ;;  %v171_v36 = vshrl.u32 %v53_v0, 7 }
  0x17   :  { %v80_v9 = vld [vmem:[%s432_s1] sm:$0xff] }
  0x18   :  { %vm57_vm0 = vcmp.lt.s32.totalorder %v54_v2, 16  ;;  %v113_v11 = vand.u32 2147483647, %v391_v7  ;;  %v88_v17 = vld [vmem:[%s435_s4] sm:$0x1]  ;;  %v172_v46 = vsub.s32 0, %v171_v36 }
  0x19   :  { %v76_v4 = vsel %vm57_vm0, %v72_v3, 0.0  ;;  %v398_v14 = vsel %vm57_vm0, %v209_v8, 0.0  ;;  %v84_v15 = vsel %vm57_vm0, %v80_v9, 0.0  ;;  %v89_v23 = vand.u32 2147483647, %v88_v17 }
  0x1a   :  { %v389_v6 = vsub.f32 %v76_v4, %v281_v5  ;;  %v117_v13 = vsub.f32 0.0, %v113_v11  ;;  %v244_v16 = vrot.slane %v398_v14, 4  ;;  %v253_v20 = vmul.f32 %v398_v14, %v84_v15 }
  0x1b   :  { %v90_v28 = vmul.f32 0.3, %v89_v23  ;;  %v92_v35 = vmul.f32 0.7, %v89_v23  ;;  %v105_v55 = vsub.f32 0.0, %v391_v7  ;;  %v190_v57 = vmul.f32 0.0, %v391_v7 }
  0x1c   :  { %v112_v10 = vand.u32 2147483647, %v389_v6  ;;  %v122_v19 = vmul.f32 1.442695, %v117_v13  ;;  %v245_v21 = vadd.f32 %v244_v16, %v398_v14  ;;  %v260_v22 = vrot.slane %v253_v20, 4 }
  0x1d   :  { %v240_v30 = vld [vmem:[%s437_s6] sm:$0x1]  ;;  %v91_v34 = vadd.f32 1.0, %v90_v28  ;;  %v104_v51 = vsub.f32 0.0, %v389_v6  ;;  %v189_v54 = vmul.f32 %v389_v6, %v84_v15  ;;  %v183_v59 = vrot.slane %v92_v35, %v172_v46 }
  0x1e   :  { %v116_v12 = vsub.f32 0.0, %v112_v10  ;;  %v246_v24 = vrot.slane %v245_v21, 2  ;;  %v261_v25 = vadd.f32 %v260_v22, %v253_v20  ;;  %v252_v38 = vld [vmem:[%s438_s7] sm:$0x1]  ;;  %v109_v3 = vmax.f32 %v105_v55, 0.0 }
  0x1f   :  { %v168_v45 = vsub.f32 %v91_v34, %v92_v35  ;;  %v108_v63 = vmax.f32 %v104_v51, 0.0  ;;  %v193_v1 = vsub.f32 %v389_v6, %v189_v54  ;;  %v194_v5 = vsub.f32 %v391_v7, %v190_v57 }
  0x20   :  { %v120_v18 = vmul.f32 1.442695, %v116_v12  ;;  %v247_v26 = vadd.f32 %v246_v24, %v245_v21  ;;  %v262_v27 = vrot.slane %v261_v25, 2 }
  0x21   :  { %v173_v49 = vrot.slane %v168_v45, %v172_v46  ;;  %v198_v17 = vmul.f32 %v194_v5, %v183_v59 }
  0x22   :  { %286 = vpow2.f32 %v120_v18  ;;  %v248_v29 = vrot.slane %v247_v26, 1  ;;  %v263_v31 = vadd.f32 %v262_v27, %v261_v25 }
  0x23   :  { %288 = vpow2.f32 %v122_v19  ;;  %v175_v58 = vmul.f32 %v173_v49, %v84_v15  ;;  %v176_v61 = vmul.f32 0.0, %v173_v49  ;;  %v197_v15 = vmul.f32 %v193_v1, %v183_v59 }
  0x24   :  { %v249_v32 = vadd.f32 %v248_v29, %v247_v26  ;;  %v264_v33 = vrot.slane %v263_v31, 1 }
  0x25   :  { %v185_v9 = vadd.f32 %v183_v59, %v175_v58  ;;  %v186_v11 = vadd.f32 %v183_v59, %v176_v61 }
  0x26   :  { %v250_v37 = vadd.f32 %v249_v32, %v240_v30  ;;  %v265_v40 = vadd.f32 %v264_v33, %v263_v31  ;;  %v224_v30 = vld [vmem:[%s436_s5] sm:$0x1] }
  0x28   :  { %251 = vst [vmem:[%s437_s6] sm:$0x1] %v250_v37  ;;  %v266_v44 = vadd.f32 %v265_v40, %v252_v38 }
  0x2a   :  { %267 = vst [vmem:[%s438_s7] sm:$0x1] %v266_v44 }
  0x2c   :  { %v287_v39 = vpop.eup %286 }
  0x2d   :  { %v289_v41 = vpop.eup %288  ;;  %v128_v42 = vadd.f32 1.0, %v287_v39  ;;  %v131_v47 = vmul.f32 -0.5, %v287_v39  ;;  %v134_v52 = vand.u32 2147483647, %v287_v39 }
  0x2e   :  { %v137_v43 = vadd.f32 1.0, %v289_v41  ;;  %v140_v48 = vmul.f32 -0.5, %v289_v41  ;;  %v143_v56 = vand.u32 2147483647, %v289_v41 }
  0x2f   :  { %290 = vlog2.f32 %v128_v42  ;;  %v132_v50 = vadd.f32 1.0, %v131_v47  ;;  %vm135_vm1 = vcmp.lt.f32.partialorder %v134_v52, 0.0004427343 }
  0x30   :  { %292 = vlog2.f32 %v137_v43  ;;  %v141_v53 = vadd.f32 1.0, %v140_v48  ;;  %vm144_vm2 = vcmp.lt.f32.partialorder %v143_v56, 0.0004427343 }
  0x31   :  { %v133_v60 = vmul.f32 %v287_v39, %v132_v50 }
  0x32   :  { %v142_v0 = vmul.f32 %v289_v41, %v141_v53 }
  0x39   :  { %v291_v62 = vpop.eup %290 }
  0x3a   :  { %v293_v2 = vpop.eup %292  ;;  %v130_v4 = vmul.f32 0.6931472, %v291_v62 }
  0x3b   :  { %v139_v8 = vmul.f32 0.6931472, %v293_v2 }
  0x3c   :  { %v136_v10 = vsel %vm135_vm1, %v133_v60, %v130_v4 }
  0x3d   :  { %v145_v12 = vsel %vm144_vm2, %v142_v0, %v139_v8  ;;  %v164_v13 = vadd.f32 %v136_v10, %v108_v63 }
  0x3e   :  { %v165_v16 = vadd.f32 %v145_v12, %v109_v3 }
  0x3f   :  { %v201_v18 = vmul.f32 %v185_v9, %v164_v13 }
  0x40   :  { %v202_v19 = vmul.f32 %v186_v11, %v165_v16 }
  0x41   :  { %v205_v20 = vadd.f32 %v201_v18, %v197_v15 }
  0x42   :  { %v206_v21 = vadd.f32 %v202_v19, %v198_v17 }
  0x43   :  { %v225_v6 = vmul.f32 %v398_v14, %v205_v20 }
  0x44   :  { %v226_v22 = vmul.f32 0.0, %v206_v21 }
  0x46   :  { %v229_v23 = vadd.f32 %v226_v22, %v225_v6 }
  0x48   :  { %v230_v24 = vadd.f32 %v229_v23, %v226_v22 }
  0x4a   :  { %v231_v25 = vadd.f32 %v230_v24, %v226_v22 }
  0x4c   :  { %v232_v7 = vrot.slane %v231_v25, 4 }
  0x4e   :  { %v233_v26 = vadd.f32 %v232_v7, %v231_v25 }
  0x50   :  { %v234_v27 = vrot.slane %v233_v26, 2 }
  0x52   :  { %v235_v28 = vadd.f32 %v234_v27, %v233_v26 }
  0x54   :  { %v236_v29 = vrot.slane %v235_v28, 1 }
  0x56   :  { %v237_v31 = vadd.f32 %v236_v29, %v235_v28 }
  0x58   :  { %v238_v32 = vadd.f32 %v237_v31, %v224_v30 }
  0x5a   :  { %239 = vst [vmem:[%s436_s5] sm:$0x1] %v238_v32 }
  0x5b   :  { %280 = vsyncpa [#allocation3], 1 }

</bundles_post_ra>
